<compile_context>
chip_gen: v7x
topology: tpu7x:2x2x1
jax: 0.10.0
libtpu: 0.0.40
codegen_flags: <defaults>
</compile_context>

<pallas_src>
import jax
import jax.numpy as jnp
from jax.experimental import pallas as pl
from jax.experimental.pallas import tpu as pltpu


def _fused_mm_kernel(xs_ref, w_ref, o_ref):
    """xs_ref: (4N, N) row-stacked [x1; x2; x3; x4]; w_ref: (N, N); o_ref: (N, N)."""
    n = o_ref.shape[0]

    # Stage 1: one tall matmul replaces the four separate x_i @ w dots.
    v = jnp.dot(xs_ref[...], w_ref[...], preferred_element_type=jnp.float32)
    v1 = v[0 * n:1 * n, :]
    v2 = v[1 * n:2 * n, :]
    v3 = v[2 * n:3 * n, :]
    v4 = v[3 * n:4 * n, :]

    # Stage 2: t1 = v2 @ v1; t2/t3 share RHS v3 -> fuse into one (2N, N) dot.
    t1 = jnp.dot(v2, v1, preferred_element_type=jnp.float32)
    t23 = jnp.dot(jnp.concatenate([v1, v4], axis=0), v3,
                  preferred_element_type=jnp.float32)

    o_ref[...] = (t1 + t23[:n, :] + t23[n:, :]).astype(o_ref.dtype)


def fused_mm_plus_mm(x1, x2, x3, x4, w1):
    n, m = x1.shape
    assert n == m, "module semantics require square N x N operands"
    assert x1.shape == x2.shape == x3.shape == x4.shape == w1.shape == (n, n)

    # Row-stack the four inputs so stage 1 is a single (4N, N) @ (N, N) matmul.
    xs = jnp.concatenate([x1, x2, x3, x4], axis=0).astype(jnp.float32)
    w = w1.astype(jnp.float32)

    # --- VMEM budget for the single-block (grid-less) layout ----------------
    # Live f32 buffers: xs (4N*N) + w (N*N) + out (N*N) + V (4N*N) + t23 (2N*N)
    # + t1 (N*N)  ~= 13 * N^2 * 4 bytes (plus I/O double-buffering slack).
    bytes_f32 = 4
    approx_vmem = 13 * n * n * bytes_f32
    assert approx_vmem * 2 < (110 << 20), (
        "single-block fused kernel would exceed VMEM at this N; "
        "use a two-phase tiled grid instead"
    )  # TODO(synk): two-phase (tm,tn,tk)-tiled fallback for very large N.

    vmem_limit = None
    if approx_vmem * 2 > (32 << 20):
        # Scoped default is ~32 MiB; raise it for mid-size N (still well under
        # the 128 MiB (v5e/v6e) / 64 MiB (v7x) physical capacity by the assert).
        vmem_limit = min(approx_vmem * 2, 100 << 20)

    cost = pl.CostEstimate(
        flops=2 * 7 * n ** 3,                      # 7 logical N^3 matmuls
        bytes_accessed=(4 * n * n + n * n + n * n) * bytes_f32,
        transcendentals=0,
    )

    vmem_spec = pl.BlockSpec(memory_space=pltpu.MemorySpace.VMEM)
    return pl.pallas_call(
        _fused_mm_kernel,
        out_shape=jax.ShapeDtypeStruct((n, n), jnp.float32),
        in_specs=[vmem_spec, vmem_spec],
        out_specs=vmem_spec,
        compiler_params=pltpu.CompilerParams(vmem_limit_bytes=vmem_limit),
        cost_estimate=cost,
    )(xs, w)


def reference(x1, x2, x3, x4, w1):
    v1 = x1 @ w1
    v2 = x2 @ w1
    v3 = x3 @ w1
    v4 = x4 @ w1
    return v2 @ v1 + v1 @ v3 + v4 @ v3


if __name__ == "__main__":
    key = jax.random.PRNGKey(0)
    k1, k2, k3, k4, kw = jax.random.split(key, 5)
    N = 2  # matches torch.randn(2, 2) in the original module
    x1 = jax.random.normal(k1, (N, N), dtype=jnp.float32)
    x2 = jax.random.normal(k2, (N, N), dtype=jnp.float32)
    x3 = jax.random.normal(k3, (N, N), dtype=jnp.float32)
    x4 = jax.random.normal(k4, (N, N), dtype=jnp.float32)
    w1 = jax.random.normal(kw, (N, N), dtype=jnp.float32)  # deterministic "parameter"

    out = fused_mm_plus_mm(x1, x2, x3, x4, w1)
    out = jax.block_until_ready(out)

    ref = reference(x1, x2, x3, x4, w1)
    assert out.shape == (N, N)
    assert jnp.allclose(out, ref, atol=1e-5, rtol=1e-5), (out, ref)
    print("KERNEL_OK")
</pallas_src>

<mosaic_0001>
module attributes {stable_mosaic.version = 11 : i64} {
  func.func @_fused_mm_kernel(%arg0: memref<8x2xf32, #tpu.memory_space<vmem>>, %arg1: memref<2x2xf32, #tpu.memory_space<vmem>>, %arg2: memref<2x2xf32, #tpu.memory_space<vmem>>) attributes {dimension_semantics = [], scalar_prefetch = 0 : i64, scratch_operands = 0 : i64, tpu.core_type = #tpu.core_type<tc>} {
    %c0 = arith.constant 0 : index
    %c0_0 = arith.constant 0 : index
    %0 = vector.load %arg0[%c0, %c0_0] : memref<8x2xf32, #tpu.memory_space<vmem>>, vector<8x2xf32>
    %c0_1 = arith.constant 0 : index
    %c0_2 = arith.constant 0 : index
    %1 = vector.load %arg1[%c0_1, %c0_2] : memref<2x2xf32, #tpu.memory_space<vmem>>, vector<2x2xf32>
    %cst = arith.constant dense<0.000000e+00> : vector<8x2xf32>
    %2 = tpu.matmul %0, %1, %cst {dimension_numbers = #tpu.dot_dimension_numbers<[1], [0], [0], [1], [0, 0, 1, 1], [], []>} : vector<8x2xf32>, vector<2x2xf32>, vector<8x2xf32> -> vector<8x2xf32>
    %3 = vector.extract_strided_slice %2 {offsets = [0, 0], sizes = [2, 2], strides = [1, 1]} : vector<8x2xf32> to vector<2x2xf32>
    %4 = vector.extract_strided_slice %2 {offsets = [2, 0], sizes = [2, 2], strides = [1, 1]} : vector<8x2xf32> to vector<2x2xf32>
    %5 = vector.extract_strided_slice %2 {offsets = [4, 0], sizes = [2, 2], strides = [1, 1]} : vector<8x2xf32> to vector<2x2xf32>
    %6 = vector.extract_strided_slice %2 {offsets = [6, 0], sizes = [2, 2], strides = [1, 1]} : vector<8x2xf32> to vector<2x2xf32>
    %cst_3 = arith.constant dense<0.000000e+00> : vector<2x2xf32>
    %7 = tpu.matmul %4, %3, %cst_3 {dimension_numbers = #tpu.dot_dimension_numbers<[1], [0], [0], [1], [0, 0, 1, 1], [], []>} : vector<2x2xf32>, vector<2x2xf32>, vector<2x2xf32> -> vector<2x2xf32>
    %8 = tpu.concatenate %3, %6 in 0 : vector<2x2xf32>, vector<2x2xf32> -> vector<4x2xf32>
    %cst_4 = arith.constant dense<0.000000e+00> : vector<4x2xf32>
    %9 = tpu.matmul %8, %5, %cst_4 {dimension_numbers = #tpu.dot_dimension_numbers<[1], [0], [0], [1], [0, 0, 1, 1], [], []>} : vector<4x2xf32>, vector<2x2xf32>, vector<4x2xf32> -> vector<4x2xf32>
    %10 = vector.extract_strided_slice %9 {offsets = [0, 0], sizes = [2, 2], strides = [1, 1]} : vector<4x2xf32> to vector<2x2xf32>
    %11 = arith.addf %7, %10 : vector<2x2xf32>
    %12 = vector.extract_strided_slice %9 {offsets = [2, 0], sizes = [2, 2], strides = [1, 1]} : vector<4x2xf32> to vector<2x2xf32>
    %13 = arith.addf %11, %12 : vector<2x2xf32>
    %c0_5 = arith.constant 0 : index
    %c0_6 = arith.constant 0 : index
    %14 = vector.load %arg2[%c0_5, %c0_6] : memref<2x2xf32, #tpu.memory_space<vmem>>, vector<2x2xf32>
    tpu.vector_store %arg2[%c0_5, %c0_6], %13 {strides = array<i32>} : memref<2x2xf32, #tpu.memory_space<vmem>>, vector<2x2xf32>,
    return
  }
}

</mosaic_0001>

<bundles_post_ra>
// kernel: tpu_custom_call.1
= control target key start
LH: loop header
LB: loop body
LE: loop exit
PB: predicated region body
PF: predicated region fallthrough
CT: control target
= control target key end

     0   :  { %vm18_vm0 = vcmask 1041408   ;;  %v320_v2 = vmov 0.0   ;;  %vm321_vm1 = vmmov 0   ;;  %vm14_vm2 = vcmask 15360   ;;  %s363_s0 = inlined_call_operand.vmem [shape: f32[8,2], index: 0, kind: input, shape index: {}]   ;;  %s364_s1 = inlined_call_operand.vmem [shape: f32[2,2], index: 1, kind: input, shape index: {}]   ;;  %s365_s2 = inlined_call_operand.hbm [shape: f32[2,2], index: 2, kind: output, shape index: {}]  }
   0x1   :  { %v13_v0 = vld [vmem:[%s364_s1] sm:$0x3]  ;;  %278 = vmatprep.subr.mxu0 %v320_v2  ;;  %280 = vmatprep.mubr.msk.f32.mxu0 %vm321_vm1, %v320_v2 }
   0x2   :  { %v12_v1 = vld [vmem:[%s363_s0] sm:$0xff] }
   0x3   :  { %7 = vsyncpa [#allocation3], 0  ;;  %279 = vmatpush3.msk.msra.mxu0 %vm18_vm0, %v13_v0  ;;  %283 = vmatprep.subr.mxu1 %v320_v2  ;;  %s322_s0 = smov [#allocation2]   ;;  %vm250_vm3 = vcmask 9216  }
   0x4   :  { %281 = vmatmul.mubr.msk.f32.vlgmr.msra.gmra.mrb[0].mxu0 %vm14_vm2, %v12_v1  ;;  %288 = vmatprep.subr.mxu0 %v320_v2  ;;  %s258_s1 = sshll.u32 %s322_s0, 4  ;;  %s259_s1 = int_to_ptr.vmem [resolvable:$true] %s258_s1 }
   0x5   :  { %290 = vmatprep.mubr.msk.f32.mxu0 %vm321_vm1, %v320_v2  ;;  %285 = vmatprep.mubr.msk.f32.mxu1 %vm321_vm1, %v320_v2  ;;  %s296_s13 = scalar_lea.vmem %s259_s1, 32  ;;  %p301_p1 = scmp.lt.s32.totalorder %s259_s1, %s259_s1 }
   0x6   :  { %p297_p0 = scmp.ne.s32.totalorder %s259_s1, %s296_s13  ;;  %p302_p2 = scmp.lt.s32.totalorder %s296_s13, %s296_s13 }
   0x8   :  { %p303_p3 = por %p302_p2, %p301_p1 }
   0xa   :  { %p304_p4 = pnand %p303_p3, %p297_p0 }
  0xd7   :  { %v88_v3 = vpop.f32.mrb[0].mxu0 }
  0xd8   :  { %v171_v4 = vrot.slane %v88_v3, 2  ;;  %v282_v5 = vpop.f32.mrb[1].mxu0  ;;  %289 = vmatpush3.msk.msra.mxu0 %vm18_vm0, %v88_v3  ;;  %v93_v6 = vrot.slane %v88_v3, 4 }
  0xda   :  { %284 = vmatpush3.msk.msra.mxu1 %vm18_vm0, %v93_v6  ;;  %291 = vmatmul.mubr.msk.f32.vlgmr.msra.gmra.mrb[2].mxu0 %vm14_vm2, %v171_v4  ;;  %v95_v7 = vsel %vm18_vm0, %v88_v3, %v93_v6 }
  0xdb   :  { %286 = vmatmul.mubr.msk.f32.vlgmr.msra.gmra.mrb[0].mxu1 %vm14_vm2, %v95_v7 }
 0x1ad   :  { %v242_v8 = vpop.f32.mrb[2].mxu0 }
 0x1ae   :  { %v167_v9 = vpop.f32.mrb[0].mxu1  ;;  %v292_v10 = vpop.f32.mrb[3].mxu0 }
 0x1af   :  { %v243_v11 = vadd.f32 %v242_v8, %v167_v9  ;;  %v247_v12 = vrot.slane %v167_v9, 2  ;;  %v287_v13 = vpop.f32.mrb[1].mxu1 }
 0x1b1   :  { %v249_v14 = vadd.f32 %v247_v12, %v243_v11 }
 0x1b3   :  { %251 = vst.msk [vmem:[#allocation2] sm:$0x3] %vm250_vm3, %v249_v14 }
 0x1b4   :  { %307 = shalt.err (!%p304_p4)
}
 0x1b5   :  { %s308_s16 = scalar_lea.hbm %s365_s2, 32 }
 0x1b6   :  { %p309_p5 = scmp.ne.s32.totalorder %s365_s2, %s308_s16  ;;  %p312_p6 = scmp.lt.u32.totalorder %s308_s16, %s365_s2 }
 0x1b8   :  { %p314_p7 = pnand %p312_p6, %p309_p5 }
 0x1ba   :  { %317 = shalt.err (!%p314_p7)
}
 0x1bb   :  { %261 = dma.vmem_to_hbm [thread:$0]  %s259_s1, 32, %s365_s2, [#allocation3]  }
 0x1bc   :  { %318 = dma.done.wait [#allocation3], 32  }
 0x1bd   :  { %319 = vsyncadd [#allocation3], 4294967264 }
 0x1be   :  { %265 = vsyncpa [#allocation3], 1 }

</bundles_post_ra>
